<compile_context>
chip_gen: v7x
topology: tpu7x:2x2x1
jax: 0.10.0
libtpu: 0.0.40
codegen_flags: <defaults>
</compile_context>

<pallas_src>
import jax
import jax.numpy as jnp
from jax.experimental import pallas as pl
from jax.experimental.pallas import tpu as pltpu


def _cdiv(a, b):
    return -(-a // b)


def _lane_patterns(params_ref):
    """Build period-2 lane patterns [w0,w1,w0,w1,...] and [c0,c1,...] (1,128)."""
    w0 = params_ref[0]
    w1 = params_ref[1]
    c0 = params_ref[2]
    c1 = params_ref[3]
    lane = jax.lax.broadcasted_iota(jnp.int32, (1, 128), 1)
    odd = (lane % 2) == 1
    w_pat = jnp.where(odd, w1, w0)   # (1, 128) f32
    c_pat = jnp.where(odd, c1, c0)   # (1, 128) f32
    return w_pat, c_pat


def _affine_kernel(params_ref, xd_ref, o_ref):
    """`other` already folded into the bias.  Pure VPU multiply-add."""
    w_pat, c_pat = _lane_patterns(params_ref)
    o_ref[...] = (xd_ref[...] * w_pat + c_pat).astype(o_ref.dtype)


def _affine_other_kernel(params_ref, xd_ref, oth_ref, o_ref):
    """Per-batch `other` (B,2): it is already in the interleaved flat layout."""
    w_pat, c_pat = _lane_patterns(params_ref)
    o_ref[...] = (xd_ref[...] * w_pat + c_pat + oth_ref[...]).astype(o_ref.dtype)


def model_forward(x, w1, b1, w2, b2, other, *,
                  block_rows=2048, min_pallas_batch=2048, force_pallas=False):
    """Equivalent of Model.forward.  x: (B, 1); other: (1, 2) or (B, 2)."""
    x = x.astype(jnp.float32)
    other = other.astype(jnp.float32)
    B, f_in = x.shape
    f_out = w2.shape[1]
    assert f_in == 1 and f_out == 2

    # ---- fold the two Linears into one affine map (host/XLA side, tiny) ----
    w_eff = (w1 @ w2).reshape(f_out).astype(jnp.float32)                        # (2,)
    b_eff = (b1.reshape(1, -1) @ w2 + b2.reshape(1, -1)).reshape(f_out)
    b_eff = b_eff.astype(jnp.float32)                                           # (2,)

    # ---- fold broadcast `other` into the bias (drops a whole kernel input) ----
    fold_other = other.ndim == 2 and other.shape[0] == 1
    c_eff = b_eff + other.reshape(f_out) if fold_other else b_eff               # (2,)

    # ---- tiny-batch fast path: a pallas launch is pure overhead here ----
    if B < min_pallas_batch and not force_pallas:
        out = x * w_eff[None, :] + c_eff[None, :]
        if not fold_other:
            out = out + other
        return out

    # ---- interleaved-lane layout: output flat (2B,) viewed as (rows, 128) ----
    N = 2 * B
    rows_needed = _cdiv(N, 128)
    if rows_needed <= 8:
        r_t = 8                                           # one minimal dense block
    elif rows_needed <= 2 * block_rows:
        r_t = ((_cdiv(rows_needed, 2) + 7) // 8) * 8      # >=2 blocks (v7x megacore)
    else:
        r_t = block_rows                                  # ~1 MiB per array per step
    num_blocks = _cdiv(rows_needed, r_t)
    rows_pad = num_blocks * r_t
    n_pad = rows_pad * 128

    # duplicate x into adjacent slots -> already matches the (B,2) flat layout
    xd = jnp.broadcast_to(x, (B, f_out)).reshape(N)       # [x0,x0,x1,x1,...]
    if n_pad != N:
        xd = jnp.pad(xd, (0, n_pad - N))
    xd = xd.reshape(rows_pad, 128)

    # 4 folded scalars travel as one tiny SMEM array
    params = jnp.concatenate([w_eff, c_eff]).astype(jnp.float32)   # (4,)

    in_specs = [
        pl.BlockSpec(memory_space=pltpu.MemorySpace.SMEM),         # params (4,)
        pl.BlockSpec((r_t, 128), lambda i: (i, 0)),                # xd
    ]
    args = [params, xd]
    kernel = _affine_kernel
    if not fold_other:
        # per-batch `other` is already interleaved: (B,2) row-major == flat layout
        oth = other.reshape(N)
        if n_pad != N:
            oth = jnp.pad(oth, (0, n_pad - N))
        oth = oth.reshape(rows_pad, 128)
        in_specs.append(pl.BlockSpec((r_t, 128), lambda i: (i, 0)))
        args.append(oth)
        kernel = _affine_other_kernel

    out2d = pl.pallas_call(
        kernel,
        out_shape=jax.ShapeDtypeStruct((rows_pad, 128), jnp.float32),
        grid=(num_blocks,),
        in_specs=in_specs,
        out_specs=pl.BlockSpec((r_t, 128), lambda i: (i, 0)),
        compiler_params=pltpu.CompilerParams(
            dimension_semantics=("parallel",)),
    )(*args)

    out_flat = out2d.reshape(-1)
    if n_pad != N:
        out_flat = out_flat[:N]
    return out_flat.reshape(B, f_out)      # free contiguous reshape, no transpose


def init_linear_params(key, in_features, out_features):
    # Deterministic init mimicking torch.nn.Linear's uniform(-1/sqrt(fan_in), ...)
    kw, kb = jax.random.split(key)
    bound = 1.0 / (in_features ** 0.5)
    # stored as (in, out) so the math is x @ W (== PyTorch's x @ W.T)
    w = jax.random.uniform(kw, (in_features, out_features), jnp.float32, -bound, bound)
    b = jax.random.uniform(kb, (1, out_features), jnp.float32, -bound, bound)
    return w, b


if __name__ == "__main__":
    key = jax.random.PRNGKey(0)
    k_x, k_other, k_l1, k_l2 = jax.random.split(key, 4)

    w1, b1 = init_linear_params(k_l1, 1, 2)   # Linear(1, 2)
    w2, b2 = init_linear_params(k_l2, 2, 2)   # Linear(2, 2)

    # 1) The module's own spec shapes: x (1, 1), other (1, 2) -> tiny-B fast path.
    x1 = jax.random.normal(k_x, (1, 1), jnp.float32)
    oth1 = jax.random.normal(k_other, (1, 2), jnp.float32)
    out1 = jax.block_until_ready(model_forward(x1, w1, b1, w2, b2, oth1))
    ref1 = (x1 @ w1 + b1) @ w2 + b2 + oth1
    assert out1.shape == (1, 2)
    assert jnp.allclose(out1, ref1, atol=1e-5, rtol=1e-5), (out1, ref1)

    # 2) Pallas kernel path: larger batch, broadcast `other` folded into the bias,
    #    two grid blocks (both TensorCores on v7x), no padding needed.
    B = 2048
    xb = jax.random.normal(k_x, (B, 1), jnp.float32)
    outb = jax.block_until_ready(
        model_forward(xb, w1, b1, w2, b2, oth1, force_pallas=True))
    refb = (xb @ w1 + b1) @ w2 + b2 + oth1
    assert outb.shape == (B, 2)
    assert jnp.allclose(outb, refb, atol=1e-5, rtol=1e-5)

    # 3) Pallas kernel path with a true per-batch `other` (B, 2) and a batch that
    #    is not tile-aligned (exercises the streamed-other kernel + padding/slice).
    B2 = 300
    x2 = jax.random.normal(k_x, (B2, 1), jnp.float32)
    oth2 = jax.random.normal(k_other, (B2, 2), jnp.float32)
    out2 = jax.block_until_ready(
        model_forward(x2, w1, b1, w2, b2, oth2, force_pallas=True))
    ref2 = (x2 @ w1 + b1) @ w2 + b2 + oth2
    assert out2.shape == (B2, 2)
    assert jnp.allclose(out2, ref2, atol=1e-5, rtol=1e-5)

    print("KERNEL_OK")
</pallas_src>

<mosaic_0001>
module attributes {stable_mosaic.version = 11 : i64} {
  func.func @_affine_kernel(%arg0: i32, %arg1: memref<4xf32, #tpu.memory_space<smem>>, %arg2: memref<16x128xf32, #tpu.memory_space<vmem>>, %arg3: memref<16x128xf32, #tpu.memory_space<vmem>>) attributes {dimension_semantics = [#tpu.dimension_semantics<parallel>], iteration_bounds = array<i64: 2>, scalar_prefetch = 0 : i64, scratch_operands = 0 : i64, tpu.core_type = #tpu.core_type<tc>, window_params = [{transform_indices = @transform_0, window_bounds = array<i64: 4>}, {transform_indices = @transform_1, window_bounds = array<i64: 16, 128>}, {transform_indices = @transform_2, window_bounds = array<i64: 16, 128>}]} {
    %c0 = arith.constant 0 : index
    %0 = memref.load %arg1[%c0] : memref<4xf32, #tpu.memory_space<smem>>
    %c1 = arith.constant 1 : index
    %1 = memref.load %arg1[%c1] : memref<4xf32, #tpu.memory_space<smem>>
    %c2 = arith.constant 2 : index
    %2 = memref.load %arg1[%c2] : memref<4xf32, #tpu.memory_space<smem>>
    %c3 = arith.constant 3 : index
    %3 = memref.load %arg1[%c3] : memref<4xf32, #tpu.memory_space<smem>>
    %4 = tpu.iota {dimensions = array<i32: 1>} : vector<1x128xi32>
    %c2_i32 = arith.constant 2 : i32
    %c0_i32 = arith.constant 0 : i32
    %5 = arith.cmpi eq, %c2_i32, %c0_i32 : i32
    %c1_i32 = arith.constant 1 : i32
    %6 = arith.select %5, %c1_i32, %c2_i32 : i32
    %7 = vector.broadcast %6 : i32 to vector<1x128xi32>
    %8 = arith.remsi %4, %7 : vector<1x128xi32>
    %c0_i32_0 = arith.constant 0 : i32
    %9 = vector.broadcast %c0_i32_0 : i32 to vector<1x128xi32>
    %10 = arith.cmpi ne, %8, %9 : vector<1x128xi32>
    %c0_i32_1 = arith.constant 0 : i32
    %11 = vector.broadcast %c0_i32_1 : i32 to vector<1x128xi32>
    %12 = arith.cmpi slt, %8, %11 : vector<1x128xi32>
    %c0_i32_2 = arith.constant 0 : i32
    %13 = arith.cmpi slt, %6, %c0_i32_2 : i32
    %14 = vector.broadcast %13 : i1 to vector<1x128xi1>
    %15 = vector.broadcast %14 : vector<1x128xi1> to vector<1x128xi1>
    %16 = arith.xori %12, %15 : vector<1x128xi1>
    %17 = arith.andi %16, %10 : vector<1x128xi1>
    %18 = vector.broadcast %6 : i32 to vector<1x128xi32>
    %19 = arith.addi %8, %18 : vector<1x128xi32>
    %20 = arith.select %17, %19, %8 : vector<1x128xi1>, vector<1x128xi32>
    %c1_i32_3 = arith.constant 1 : i32
    %21 = vector.broadcast %c1_i32_3 : i32 to vector<1x128xi32>
    %22 = arith.cmpi eq, %20, %21 : vector<1x128xi32>
    %23 = vector.broadcast %1 : f32 to vector<1x128xf32>
    %24 = vector.broadcast %0 : f32 to vector<1x128xf32>
    %25 = arith.select %22, %23, %24 : vector<1x128xi1>, vector<1x128xf32>
    %26 = vector.broadcast %3 : f32 to vector<1x128xf32>
    %27 = vector.broadcast %2 : f32 to vector<1x128xf32>
    %28 = arith.select %22, %26, %27 : vector<1x128xi1>, vector<1x128xf32>
    %c0_4 = arith.constant 0 : index
    %c0_5 = arith.constant 0 : index
    %29 = vector.load %arg2[%c0_4, %c0_5] : memref<16x128xf32, #tpu.memory_space<vmem>>, vector<16x128xf32>
    %30 = vector.broadcast %25 : vector<1x128xf32> to vector<16x128xf32>
    %31 = arith.mulf %29, %30 : vector<16x128xf32>
    %32 = vector.broadcast %28 : vector<1x128xf32> to vector<16x128xf32>
    %33 = arith.addf %31, %32 : vector<16x128xf32>
    %c0_6 = arith.constant 0 : index
    %c0_7 = arith.constant 0 : index
    %34 = vector.load %arg3[%c0_6, %c0_7] : memref<16x128xf32, #tpu.memory_space<vmem>>, vector<16x128xf32>
    tpu.vector_store %arg3[%c0_6, %c0_7], %33 {strides = array<i32>} : memref<16x128xf32, #tpu.memory_space<vmem>>, vector<16x128xf32>,
    return
  }
  func.func @transform_0(%arg0: i32) -> i32 {
    %c0_i32 = arith.constant 0 : i32
    %c0_i32_0 = arith.constant 0 : i32
    return %c0_i32 : i32
  }
  func.func @transform_1(%arg0: i32) -> (i32, i32) {
    %c0_i32 = arith.constant 0 : i32
    %c0_i32_0 = arith.constant 0 : i32
    return %arg0, %c0_i32 : i32, i32
  }
  func.func @transform_2(%arg0: i32) -> (i32, i32) {
    %c0_i32 = arith.constant 0 : i32
    %c0_i32_0 = arith.constant 0 : i32
    return %arg0, %c0_i32 : i32, i32
  }
}

</mosaic_0001>

<bundles_post_ra>
// kernel: tpu_custom_call.1
= control target key start
LH: loop header
LB: loop body
LE: loop exit
PB: predicated region body
PF: predicated region fallthrough
CT: control target
= control target key end

     0   :  { %7 = vsyncpa [#allocation5], 0  ;;  %s717_s0 = inlined_call_operand.hbm [shape: f32[4], index: 0, kind: input, shape index: {}]   ;;  %s718_s1 = inlined_call_operand.hbm [shape: f32[32,128], index: 1, kind: input, shape index: {}]   ;;  %s719_s2 = inlined_call_operand.hbm [shape: f32[32,128], index: 2, kind: output, shape index: {}]  }
   0x1   :  { %8 = vsyncpa [#allocation3], 0 }
   0x2   :  { %10 = vsyncpa [#allocation3 + $0x1], 0 }
   0x3   :  { %11 = vsyncpa [#allocation4], 0 }
   0x4   :  { %13 = vsyncpa [#allocation4 + $0x1], 0  ;;  %s527_s9 = smov 0   ;;  %s529_s10 = smov 0  }
   0x5   :  { %s531_s11 = smov 0   ;;  %s533_s12 = smov 0  }
   0x6 LB: > { %s548_s13 = sadd.s32 4294967295, %s503_s12   ;;  %s308_s14 = sadd.s32 4294967294, %s503_s12   ;;  %s503_s12 = sphi %s533_s12, %s739_s12   ;;  %s499_s11 = sphi %s531_s11, %s738_s11   ;;  %s495_s10 = sphi %s529_s10, %s737_s10   ;;  %s491_s9 = sphi %s527_s9, %s736_s9  }
   0x7   : > { %s552_s15 = sadd.s32 1, %s503_s12   ;;  %s47_s16 = sadd.s32 1, %s499_s11 }
   0x8   : > { %s44_s17 = ssub.s32 %s503_s12, %s552_s15  ;;  %p54_p0 = scmp.ne.s32.totalorder %s499_s11, %s495_s10 }
   0x9   : > { %p45_p1 = scmp.eq.s32.totalorder %s44_s17, 0  ;;  %p55_p2 = scmp.eq.s32.totalorder %s503_s12, 0 }
   0xa   : > { %p60_p3 = scmp.ne.s32.totalorder %s495_s10, %s491_s9  ;;  %p720_p4 = scmp.eq.s32.totalorder %s548_s13, 0 }
   0xb   : > { %s564_s18 = scalar_select %p45_p1, %s499_s11, %s47_s16  }
   0xc   : > { %p566_p5 = por %p55_p2, %p54_p0  ;;  %p572_p6 = por %p720_p4, %p60_p3 }
   0xd   : > { %p84_p7 = scmp.eq.s32.totalorder %s548_s13, 1  ;;  %p90_p8 = scmp.eq.s32.totalorder %s308_s14, 1 }
   0xe   : > { %s724_s20 = scalar_select %p572_p6, 1, 0 }
   0xf   : > { %p309_p9 = scmp.ge.s32.totalorder %s503_s12, 1  ;;  %p97_p10 = scmp.lt.s32.totalorder %s503_s12, 3 }
  0x10   : > { %p579_p11 = por %p84_p7, %p54_p0  ;;  %p583_p12 = por %p90_p8, %p60_p3 }
  0x11   : > { %p587_p13 = pnand %p309_p9, %p97_p10  ;;  %p350_p4 = scmp.lt.s32.totalorder %s503_s12, 2 }
  0x12   : > { %s725_s21 = scalar_select %p579_p11, 1, 0 }
  0x13   : > { %s726_s22 = scalar_select %p583_p12, 1, 0 }
  0x14   : > { %p337_p2 = pneg %p587_p13  ;;  %s119_s24 = sand.u32 1, %s499_s11  }
  0x15   : > { %s327_s25 = sshll.u32 %s503_s12, 8  ;;  %p728_p6 = scmp.eq.s32.totalorder %s548_s13, 0 }
  0x16   : > { %p601_p7 = pnand %p350_p4, %p566_p5  ;;  %s312_s27 = sshll.u32 %s119_s24, 4 }
  0x17   : > { %p338_p0 = pnand %p337_p2, %p728_p6  ;;  %s390_s30 = scalar_lea.hbm %s717_s0, 16 }
  0x18   : > { %p391_p3 = scmp.ne.s32.totalorder %s717_s0, %s390_s30  ;;  %p397_p6 = scmp.lt.u32.totalorder %s390_s30, %s717_s0 }
  0x19   : > { %p392_p8 = pneg %p338_p0 }
  0x1b   : > { %p393_p9 = pnand %p392_p8, %p391_p3 }
  0x1d   : > { %p394_p10 = pneg %p393_p9 }
  0x1f   : > { %p399_p4 = pnand %p397_p6, %p394_p10 }
  0x21   : > { %402 = shalt.err (!%p399_p4)
}
  0x22   : > { %s505_s7 = smov [#allocation2]   ;;  %s620_s19 = scalar_lea.hbm %s718_s1, %s327_s25 }
  0x23   : > { %340 = dma.hbm_to_smem (!%p338_p0), %s717_s0, 16, %s505_s7, [#allocation5]  }
  0x24   : > { %s123_s28 = scalar_lea.vmem [#allocation6], %s312_s27  ;;  %s624_s30 = scalar_lea.sflag [#allocation3], %s119_s24 }
  0x25   : > { %s130_s29 = sshll.u32 %s123_s28, 4  ;;  %s403_s3 = scalar_lea.hbm %s620_s19, 256  ;;  %s622_s29 = int_to_ptr.vmem [resolvable:$true] %s130_s29 }
  0x26   : > { %p404_p5 = scmp.ne.s32.totalorder %s620_s19, %s403_s3  ;;  %p405_p2 = pneg %p601_p7 }
  0x27   : > { %s408_s5 = scalar_lea.hbm %s718_s1, 512  ;;  %p409_p8 = scmp.lt.u32.totalorder %s620_s19, %s718_s1 }
  0x28   : > { %p406_p0 = pnand %p405_p2, %p404_p5  ;;  %p410_p9 = scmp.lt.u32.totalorder %s408_s5, %s403_s3 }
  0x29   : > { %p412_p6 = scmp.lt.u32.totalorder %s403_s3, %s620_s19 }
  0x2a   : > { %p407_p3 = pneg %p406_p0  ;;  %p411_p10 = por %p410_p9, %p409_p8 }
  0x2c   : > { %p413_p4 = por %p412_p6, %p411_p10 }
  0x2e   : > { %p414_p1 = pnand %p413_p4, %p407_p3 }
  0x30   : > { %417 = shalt.err (!%p414_p1)
}
  0x31   : > { %s418_s24 = scalar_lea.vmem %s622_s29, 256  ;;  %s506_s27 = smov [#allocation6]  }
  0x32   : > { %p419_p5 = scmp.ne.s32.totalorder %s622_s29, %s418_s24  ;;  %s423_s8 = sshll.u32 %s506_s27, 4  ;;  %s424_s8 = int_to_ptr.vmem [resolvable:$false] %s423_s8 }
  0x33   : > { %s425_s14 = scalar_lea.vmem %s424_s8, 512  ;;  %p426_p11 = scmp.lt.s32.totalorder %s622_s29, %s424_s8 }
  0x34   : > { %p421_p0 = pnand %p419_p5, %p405_p2  ;;  %p427_p8 = scmp.lt.s32.totalorder %s425_s14, %s418_s24 }
  0x36   : > { %p422_p12 = pneg %p421_p0  ;;  %p428_p9 = por %p427_p8, %p426_p11 }
  0x38   : > { %p429_p10 = pnand %p428_p9, %p422_p12 }
  0x3a   : > { %432 = shalt.err (!%p429_p10)
}
  0x3b   : > { %s507_s16 = smov 128   ;;  %s508_s17 = smov 8  }
  0x3c   : > { %344 = dma.hbm_to_vmem [thread:$0]  (!%p601_p7), %s620_s19, 256, %s622_s29, %s624_s30, %s507_s16, %s507_s16, %s508_s17  }
  0x3d   : > { %142 = sbr.rel (%p587_p13) target bundleno = 104 (0x68), region = 28  ;;  %p730_p1 = scmp.eq.s32.totalorder (!%p587_p13), %s548_s13, 0 }
  0x44   : > { %478 = dma.done.wait (%p730_p1), [#allocation5], 16   ;;  %p731_p2 = pmov %p730_p1 }
  0x45   : > { %s659_s28 = sand.u32 1, %s495_s10   ;;  %p732_p11 = scmp.ne.s32.totalorder %s724_s20, 0 }
  0x46   : > { %480 = vsyncadd (%p731_p2), [#allocation5], 4294967280  ;;  %s317_s3 = sshll.u32 %s659_s28, 4  ;;  %s149_s25 = scalar_lea.sflag [#allocation3], %s659_s28 }
  0x47   : > { %s152_s4 = scalar_lea.vmem [#allocation6], %s317_s3 }
  0x48   : > { %482 = dma.done.wait (%p732_p11), %s149_s25, 256  }
  0x49   : > { %484 = vsyncadd (%p732_p11), %s149_s25, 4294967040 }
  0x4a   : > { %157 = sfence }
  0x4b   : > { %s176_s23 = sld [smem:[#allocation2]]  ;;  %v180_v0 = vlaneseq  ;;  %s319_s26 = sld [smem:[#allocation2 + $0x1]]  ;;  %v201_v4 = vld [vmem:[%s152_s4] sm:$0xff]  ;;  %v202_v5 = vld [vmem:[%s152_s4 + $0x8] sm:$0xff] }
  0x4c   : > { %s320_s19 = sld [smem:[#allocation2 + $0x2]]  ;;  %s321_s29 = sld [smem:[#allocation2 + $0x3]] }
  0x4d   : > { %v181_v1 = vand.u32 127, %v180_v0  ;;  %s173_s30 = scalar_lea.vmem [#allocation7], %s317_s3  ;;  %s328_s20 = sshll.u32 %s548_s13, 8 }
  0x4e   : > { %s223_s5 = sshll.u32 %s173_s30, 4  ;;  %s673_s24 = scalar_lea.hbm %s719_s2, %s328_s20  ;;  %s668_s5 = int_to_ptr.vmem [resolvable:$true] %s223_s5 }
  0x4f   : > { %v186_v2 = vand.u32 1, %v181_v1  ;;  %s210_s27 = scalar_lea.sflag [#allocation4], %s659_s28  ;;  %s433_s8 = scalar_lea.vmem %s668_s5, 256 }
  0x50   : > { %p434_p12 = scmp.ne.s32.totalorder %s668_s5, %s433_s8  ;;  %p733_p13 = scmp.ne.s32.totalorder %s725_s21, 0 }
  0x51   : > { %vm194_vm0 = vcmp.eq.s32.totalorder %v186_v2, 1  ;;  %v196_v3 = vstv %s176_s23  ;;  %v195_v6 = vstv %s319_s26  ;;  %s509_s13 = smov [#allocation7]  }
  0x52   : > { %v199_v7 = vstv %s320_s19  ;;  %v197_v8 = vsel %vm194_vm0, %v195_v6, %v196_v3  ;;  %v198_v9 = vstv %s321_s29  ;;  %p435_p7 = pnand %p434_p12, %p733_p13  ;;  %s437_s14 = sshll.u32 %s509_s13, 4  ;;  %s438_s14 = int_to_ptr.vmem [resolvable:$false] %s437_s14 }
  0x53   : > { %v200_v10 = vsel %vm194_vm0, %v198_v9, %v199_v7  ;;  %v203_v11 = vmul.f32 %v201_v4, %v197_v8  ;;  %v204_v12 = vmul.f32 %v202_v5, %v197_v8  ;;  %s439_s16 = scalar_lea.vmem %s438_s14, 512  ;;  %p440_p6 = scmp.lt.s32.totalorder %s668_s5, %s438_s14 }
  0x54   : > { %p436_p3 = pneg %p435_p7  ;;  %p441_p4 = scmp.lt.s32.totalorder %s439_s16, %s433_s8 }
  0x55   : > { %v205_v13 = vadd.f32 %v203_v11, %v200_v10  ;;  %v206_v14 = vadd.f32 %v204_v12, %v200_v10 }
  0x56   : > { %p442_p5 = por %p441_p4, %p440_p6 }
  0x57   : > { %207 = vst [vmem:[%s173_s30] sm:$0xff] %v205_v13  ;;  %208 = vst [vmem:[%s173_s30 + $0x8] sm:$0xff] %v206_v14 }
  0x58   : > { %p443_p0 = pnand %p442_p5, %p436_p3 }
  0x5a   : > { %446 = shalt.err (!%p443_p0)
}
  0x5b   : > { %s447_s17 = scalar_lea.hbm %s673_s24, 256  ;;  %s451_s4 = scalar_lea.hbm %s719_s2, 512 }
  0x5c   : > { %p448_p8 = scmp.ne.s32.totalorder %s673_s24, %s447_s17  ;;  %p452_p1 = scmp.lt.u32.totalorder %s673_s24, %s719_s2 }
  0x5d   : > { %p453_p2 = scmp.lt.u32.totalorder %s451_s4, %s447_s17  ;;  %p455_p12 = scmp.lt.u32.totalorder %s447_s17, %s673_s24 }
  0x5e   : > { %p449_p9 = pnand %p448_p8, %p733_p13 }
  0x5f   : > { %p454_p11 = por %p453_p2, %p452_p1 }
  0x60   : > { %p450_p10 = pneg %p449_p9 }
  0x61   : > { %p456_p7 = por %p455_p12, %p454_p11 }
  0x63   : > { %p457_p3 = pnand %p456_p7, %p450_p10 }
  0x65   : > { %460 = shalt.err (!%p457_p3)
}
  0x66   : > { %s510_s19 = smov 128   ;;  %s511_s29 = smov 8  }
  0x67   : > { %335 = dma.vmem_to_hbm [thread:$0]  (%p733_p13), %s668_s5, 256, %s673_s24, %s210_s27, %s510_s19, %s510_s19, %s511_s29  }
  0x68 PF: > { %s238_s30 = sand.u32 1, %s491_s9   ;;  %p734_p6 = scmp.ne.s32.totalorder %s726_s22, 0 }
  0x69   : > { %p735_p4 = scmp.ge.s32.totalorder %s503_s12, 2  ;;  %s239_s20 = scalar_lea.sflag [#allocation4], %s238_s30 }
  0x6b   : > { %p346_p5 = pnand %p735_p4, %p734_p6 }
  0x6d   : > { %486 = dma.done.wait (!%p346_p5), %s239_s20, 256  }
  0x6e   : > { %488 = vsyncadd (!%p346_p5), %s239_s20, 4294967040  ;;  %p16_p0 = scmp.ge.s32.totalorder %s552_s15, 4   ;;  %s736_s9 = smov %s495_s10 }
  0x6f   : > { %s737_s10 = smov %s499_s11  ;;  %s738_s11 = smov %s564_s18 }
  0x70   : > { %s739_s12 = smov %s552_s15  ;;  %18 = sbr.rel (!%p16_p0) target bundleno = 6 (0x6), region = 78 }
  0x77   :  { %244 = vsyncpa [#allocation3], 1 }
  0x78   :  { %246 = vsyncpa [#allocation3 + $0x1], 1 }
  0x79   :  { %247 = vsyncpa [#allocation4], 1 }
  0x7a   :  { %249 = vsyncpa [#allocation4 + $0x1], 1 }
  0x7b   :  { %250 = vsyncpa [#allocation5], 1 }
  0x7c   :  { %252 = vsyncpa [#allocation5 + $0x1], 1 }

</bundles_post_ra>
